<compile_context>
chip_gen: v7x
topology: tpu7x:2x2x1
jax: 0.10.0
libtpu: 0.0.40
codegen_flags: <defaults>
</compile_context>

<pallas_src>
import functools

import numpy as np
import jax
import jax.numpy as jnp
from jax.experimental import pallas as pl
from jax.experimental.pallas import tpu as pltpu


# Below this size the kernel-launch overhead (~1-2 us) dwarfs the copy, so the
# default path skips Pallas entirely and returns the stored constant.
_SMALL_BYTES_THRESHOLD = 1 << 20  # 1 MiB


# ---------------------------------------------------------------------------
# Pallas kernel: materialize one tile of the stored constant into the output.
# ---------------------------------------------------------------------------
def _always_copy_kernel(val_ref, o_ref):
    # forward(x) == self.val : a pure streaming copy of the constant tile.
    o_ref[...] = val_ref[...]


def _sublane_pack(itemsize):
    # f32 -> 8 sublanes, bf16/f16 -> 16, int8/fp8 -> 32
    return {4: 8, 2: 16, 1: 32}.get(itemsize, 8)


def _choose_tiles(R, C, itemsize, target_block_bytes=2 << 20):
    """Pick (tr, tc) so one block stays under ~2 MiB.

    With double-buffered input + output that is <= ~8 MiB of VMEM, safely
    inside the scoped limit on every TPU generation (incl. v7x's 64 MiB).
    C is guaranteed to be a multiple of 128 by the wrapper, so tc is always a
    multiple of 128 (lane-dense, unmasked stores).
    """
    pack = _sublane_pack(itemsize)
    tc = min(C, 2048)  # multiple of 128 since C % 128 == 0
    rows_budget = max(1, target_block_bytes // max(1, tc * itemsize))
    if R <= pack:
        tr = R  # full (short) row extent — allowed as a full-dim block
    else:
        tr = min(R, rows_budget)
        tr = max(pack, (tr // pack) * pack)  # multiple of the sublane pack
    return tr, tc


@functools.partial(jax.jit, static_argnames=("tr", "tc"))
def _always_pallas_2d(val2d, *, tr, tc):
    """Tiled (R, C) -> (R, C) copy via Pallas; lane-dense, byte-budgeted."""
    R, C = val2d.shape
    itemsize = jnp.dtype(val2d.dtype).itemsize
    grid = (pl.cdiv(R, tr), pl.cdiv(C, tc))
    return pl.pallas_call(
        _always_copy_kernel,
        out_shape=jax.ShapeDtypeStruct((R, C), val2d.dtype),
        grid_spec=pltpu.PrefetchScalarGridSpec(
            num_scalar_prefetch=0,
            grid=grid,
            in_specs=[pl.BlockSpec((tr, tc), lambda i, j: (i, j))],
            out_specs=pl.BlockSpec((tr, tc), lambda i, j: (i, j)),
        ),
        compiler_params=pltpu.CompilerParams(
            dimension_semantics=("parallel", "parallel"),
            vmem_limit_bytes=32 * 1024 * 1024,
        ),
        cost_estimate=pl.CostEstimate(
            flops=0, transcendentals=0, bytes_accessed=2 * R * C * itemsize
        ),
    )(val2d)


def _to_lane_dense_2d(val):
    """Reshape to a 2-D slab whose last dim is a multiple of 128, or None."""
    if val.ndim >= 1 and val.shape[-1] > 0 and val.shape[-1] % 128 == 0:
        return val.reshape(-1, val.shape[-1])
    total = val.size
    for tc in (2048, 1024, 512, 256, 128):
        if total > 0 and total % tc == 0:
            return val.reshape(total // tc, tc)
    return None


# ---------------------------------------------------------------------------
# Module wrapper
# ---------------------------------------------------------------------------
class AlwaysPallas:
    """JAX/Pallas port of `Always`: __call__(x) ignores x and returns val."""

    def __init__(self, val):
        self.val = val

    def __call__(self, x, *, materialize=False):
        del x  # forward ignores its input entirely, by definition of Always
        val = self.val
        if not isinstance(val, (jax.Array, np.ndarray)):
            # Non-array vals (None / python scalars) involve no device work;
            # returned as-is, same as the torch module.
            return val
        val = jnp.asarray(val)
        nbytes = val.size * jnp.dtype(val.dtype).itemsize

        # Fast path: the op is an identity, so for small constants (or unless
        # a fresh buffer is explicitly requested) do zero device work.
        if not materialize and nbytes < _SMALL_BYTES_THRESHOLD:
            return val

        v2d = _to_lane_dense_2d(val)
        if v2d is None:
            # TODO(synk): constants whose total size is not a multiple of 128
            # would need padding for a lane-dense Pallas copy; use a plain XLA
            # copy instead (still exact).
            return jnp.array(val)

        R, C = v2d.shape
        tr, tc = _choose_tiles(R, C, jnp.dtype(v2d.dtype).itemsize)
        out2d = _always_pallas_2d(v2d, tr=tr, tc=tc)
        return out2d.reshape(val.shape)


if __name__ == "__main__":
    key = jax.random.PRNGKey(0)
    k_val, k_x = jax.random.split(key, 2)

    # Small shapes consistent with the module: the stored constant is a
    # (16, 256) tensor (sublane-/lane-aligned); the ignored input x is (2, 8, 32).
    val = jax.random.normal(k_val, (16, 256), dtype=jnp.float32)
    x = jax.random.normal(k_x, (2, 8, 32), dtype=jnp.float32)

    module = AlwaysPallas(val)

    # Default path: small constant -> zero device work, returns the stored value.
    out_fast = module(x)
    jax.block_until_ready(out_fast)
    assert out_fast.shape == val.shape
    assert jnp.array_equal(out_fast, val)

    # Explicit materializing path: exercises the tiled Pallas streaming-copy kernel.
    out_copy = module(x, materialize=True)
    jax.block_until_ready(out_copy)
    assert out_copy.shape == val.shape
    assert jnp.array_equal(out_copy, val)

    print("KERNEL_OK")
</pallas_src>

<mosaic_0001>
module attributes {stable_mosaic.version = 11 : i64} {
  func.func @_always_copy_kernel(%arg0: i32, %arg1: i32, %arg2: memref<16x256xf32, #tpu.memory_space<vmem>>, %arg3: memref<16x256xf32, #tpu.memory_space<vmem>>) attributes {dimension_semantics = [#tpu.dimension_semantics<parallel>, #tpu.dimension_semantics<parallel>], iteration_bounds = array<i64: 1, 1>, scalar_prefetch = 0 : i64, scratch_operands = 0 : i64, tpu.core_type = #tpu.core_type<tc>, window_params = [{transform_indices = @transform_0, window_bounds = array<i64: 16, 256>}, {transform_indices = @transform_1, window_bounds = array<i64: 16, 256>}]} {
    %c0 = arith.constant 0 : index
    %c0_0 = arith.constant 0 : index
    %0 = vector.load %arg2[%c0, %c0_0] : memref<16x256xf32, #tpu.memory_space<vmem>>, vector<16x256xf32>
    %c0_1 = arith.constant 0 : index
    %c0_2 = arith.constant 0 : index
    %1 = vector.load %arg3[%c0_1, %c0_2] : memref<16x256xf32, #tpu.memory_space<vmem>>, vector<16x256xf32>
    tpu.vector_store %arg3[%c0_1, %c0_2], %0 {strides = array<i32>} : memref<16x256xf32, #tpu.memory_space<vmem>>, vector<16x256xf32>,
    return
  }
  func.func @transform_0(%arg0: i32, %arg1: i32) -> (i32, i32) {
    %c0_i32 = arith.constant 0 : i32
    return %arg0, %arg1 : i32, i32
  }
  func.func @transform_1(%arg0: i32, %arg1: i32) -> (i32, i32) {
    %c0_i32 = arith.constant 0 : i32
    return %arg0, %arg1 : i32, i32
  }
}

</mosaic_0001>

<bundles_post_ra>
// kernel: _always_pallas_2d.1
= control target key start
LH: loop header
LB: loop body
LE: loop exit
PB: predicated region body
PF: predicated region fallthrough
CT: control target
= control target key end

     0   :  { %6 = vsyncpa [#allocation3], 0  ;;  %s144_s0 = inlined_call_operand.hbm [shape: f32[16,256], index: 0, kind: input, shape index: {}]   ;;  %s145_s1 = inlined_call_operand.hbm [shape: f32[16,256], index: 1, kind: output, shape index: {}]  }
   0x1   :  { %7 = vsyncpa [#allocation4], 0  ;;  %s100_s6 = smov [#allocation2]   ;;  %s52_s10 = scalar_lea.hbm %s144_s0, 512 }
   0x2   :  { %s13_s7 = sshll.u32 %s100_s6, 4  ;;  %p53_p0 = scmp.ne.s32.totalorder %s144_s0, %s52_s10  ;;  %s14_s7 = int_to_ptr.vmem [resolvable:$true] %s13_s7 }
   0x3   :  { %p56_p1 = scmp.lt.u32.totalorder %s52_s10, %s144_s0 }
   0x5   :  { %p58_p2 = pnand %p56_p1, %p53_p0 }
   0x7   :  { %61 = shalt.err (!%p58_p2)
}
   0x8   :  { %s62_s15 = scalar_lea.vmem %s14_s7, 512  ;;  %p67_p4 = scmp.lt.s32.totalorder %s14_s7, %s14_s7 }
   0x9   :  { %p63_p3 = scmp.ne.s32.totalorder %s14_s7, %s62_s15  ;;  %p68_p5 = scmp.lt.s32.totalorder %s62_s15, %s62_s15 }
   0xb   :  { %p69_p6 = por %p68_p5, %p67_p4 }
   0xd   :  { %p70_p7 = pnand %p69_p6, %p63_p3 }
   0xf   :  { %73 = shalt.err (!%p70_p7)
}
  0x10   :  { %s101_s16 = smov 256   ;;  %s102_s17 = smov 16  }
  0x11   :  { %19 = dma.hbm_to_vmem [thread:$0]  %s144_s0, 512, %s14_s7, [#allocation3], %s101_s16, %s101_s16, %s102_s17  }
  0x12   :  { %96 = dma.done.wait [#allocation3], 512  }
  0x13   :  { %97 = vsyncadd [#allocation3], 4294966784  ;;  %s103_s20 = smov [#allocation5]   ;;  %v23_v0 = vld [vmem:[#allocation2] sm:$0xff]  ;;  %v24_v1 = vld [vmem:[#allocation2 + $0x8] sm:$0xff] }
  0x14   :  { %s36_s21 = sshll.u32 %s103_s20, 4  ;;  %v25_v2 = vld [vmem:[#allocation2 + $0x10] sm:$0xff]  ;;  %27 = vst [vmem:[#allocation5] sm:$0xff] %v23_v0  ;;  %28 = vst [vmem:[#allocation5 + $0x8] sm:$0xff] %v24_v1  ;;  %v26_v3 = vld [vmem:[#allocation2 + $0x18] sm:$0xff]  ;;  %s37_s21 = int_to_ptr.vmem [resolvable:$true] %s36_s21 }
  0x15   :  { %29 = vst [vmem:[#allocation5 + $0x10] sm:$0xff] %v25_v2  ;;  %30 = vst [vmem:[#allocation5 + $0x18] sm:$0xff] %v26_v3  ;;  %s74_s22 = scalar_lea.vmem %s37_s21, 512  ;;  %p79_p9 = scmp.lt.s32.totalorder %s37_s21, %s37_s21 }
  0x16   :  { %p75_p8 = scmp.ne.s32.totalorder %s37_s21, %s74_s22  ;;  %p80_p10 = scmp.lt.s32.totalorder %s74_s22, %s74_s22 }
  0x18   :  { %p81_p11 = por %p80_p10, %p79_p9 }
  0x1a   :  { %p82_p12 = pnand %p81_p11, %p75_p8 }
  0x1c   :  { %85 = shalt.err (!%p82_p12)
}
  0x1d   :  { %s86_s24 = scalar_lea.hbm %s145_s1, 512 }
  0x1e   :  { %p87_p13 = scmp.ne.s32.totalorder %s145_s1, %s86_s24  ;;  %p90_p0 = scmp.lt.u32.totalorder %s86_s24, %s145_s1 }
  0x20   :  { %p92_p1 = pnand %p90_p0, %p87_p13 }
  0x22   :  { %95 = shalt.err (!%p92_p1)
}
  0x23   :  { %42 = dma.vmem_to_hbm [thread:$0]  %s37_s21, 512, %s145_s1, [#allocation4], %s101_s16, %s101_s16, %s102_s17  }
  0x24   :  { %98 = dma.done.wait [#allocation4], 512  }
  0x25   :  { %99 = vsyncadd [#allocation4], 4294966784 }
  0x26   :  { %46 = vsyncpa [#allocation3], 1 }
  0x27   :  { %47 = vsyncpa [#allocation4], 1 }

</bundles_post_ra>
